<compile_context>
chip_gen: v5e
topology: v5e:2x2
jax: 0.10.0
libtpu: 0.0.40
codegen_flags: <defaults>
</compile_context>

<pallas_src>
import random
from functools import partial

import numpy as np

import jax
import jax.numpy as jnp
from jax.experimental import pallas as pl
from jax.experimental.pallas import tpu as pltpu


def mean_agg_kernel(mask_ref, emb_ref, inv_ref, out_ref, acc_ref):
    """acc (+)= mask_tile @ emb_tile on the MXU; scale by host 1/deg at the end."""
    k = pl.program_id(2)

    prod = jnp.dot(mask_ref[...], emb_ref[...],
                   preferred_element_type=jnp.float32)

    @pl.when(k == 0)
    def _():
        acc_ref[...] = prod          # first k-step: direct write, no zero-init

    @pl.when(k > 0)
    def _():
        acc_ref[...] += prod

    @pl.when(k == pl.num_programs(2) - 1)
    def _():
        # inv_ref is host-precomputed 1/deg (padded / empty rows get 1.0 and
        # their accumulated rows are exactly zero), so no NaN guard is needed.
        out_ref[...] = (acc_ref[...] * inv_ref[...]).astype(out_ref.dtype)


def _round_up(x, m):
    return ((x + m - 1) // m) * m


def _pick_sublane_tile(padded_dim, cap):
    """Largest multiple-of-16 tile <= cap that divides padded_dim (bf16 packing)."""
    t = max(16, (min(cap, padded_dim) // 16) * 16)
    while padded_dim % t != 0:
        t -= 16
    return t


def _pick_lane_tile(padded_dim, cap):
    """Largest multiple-of-128 tile <= cap that divides padded_dim."""
    t = max(128, (min(cap, padded_dim) // 128) * 128)
    while padded_dim % t != 0:
        t -= 128
    return t


def _maybe_split_for_two_cores(Bp, Dp, tm, tn):
    """Ensure >= 2 parallel output blocks so a 2-TensorCore chip (v7x) isn't idle."""
    if (Bp // tm) * (Dp // tn) >= 2:
        return tm, tn
    if Dp >= 256:
        tn2 = _pick_lane_tile(Dp, max(128, Dp // 2))
        if Dp // tn2 >= 2:
            return tm, tn2
    if Bp >= 32:
        tm2 = _pick_sublane_tile(Bp, max(16, Bp // 2))
        if Bp // tm2 >= 2:
            return tm2, tn
    return tm, tn


def mean_aggregate_pallas(mask_bf16, emb_bf16, inv_counts_f32, tm, tn, tk):
    """mask: (Bp,Up) bf16, emb: (Up,Dp) bf16, inv: (Bp,1) f32 -> (Bp,Dp) f32."""
    Bp, Up = mask_bf16.shape
    Up2, Dp = emb_bf16.shape
    assert Up == Up2
    assert Bp % tm == 0 and Dp % tn == 0 and Up % tk == 0

    grid = (Bp // tm, Dp // tn, Up // tk)

    # Double-buffered working set + accumulator, with margin; this keeps the
    # larger tiles safe under v5e's 16 MiB scoped-VMEM default.
    work_bytes = 2 * (tm * tk * 2 + tk * tn * 2 + tm * 4 + tm * tn * 4) + tm * tn * 4
    vmem_limit = int(min(max(work_bytes * 3 // 2 + (2 << 20), 16 << 20), 40 << 20))

    cost = pl.CostEstimate(
        flops=2 * Bp * Up * Dp,
        transcendentals=0,
        bytes_accessed=Bp * Up * 2 + Up * Dp * 2 + Bp * 4 + Bp * Dp * 4,
    )

    return pl.pallas_call(
        mean_agg_kernel,
        out_shape=jax.ShapeDtypeStruct((Bp, Dp), jnp.float32),
        grid_spec=pltpu.PrefetchScalarGridSpec(
            num_scalar_prefetch=0,
            grid=grid,
            in_specs=[
                pl.BlockSpec((tm, tk), lambda i, j, k: (i, k)),   # mask tile
                pl.BlockSpec((tk, tn), lambda i, j, k: (k, j)),   # embed tile
                pl.BlockSpec((tm, 1), lambda i, j, k: (i, 0)),    # 1/deg per row
            ],
            out_specs=pl.BlockSpec((tm, tn), lambda i, j, k: (i, j)),
            scratch_shapes=[pltpu.VMEM((tm, tn), jnp.float32)],
        ),
        compiler_params=pltpu.CompilerParams(
            dimension_semantics=("parallel", "parallel", "arbitrary"),
            vmem_limit_bytes=vmem_limit),
        cost_estimate=cost,
    )(mask_bf16, emb_bf16, inv_counts_f32)


@partial(jax.jit, static_argnames=("tm", "tn", "tk"))
def _gather_and_aggregate(mask_bf16, feat_padded_bf16, idx, inv_counts_f32,
                          tm, tn, tk):
    # Fuse the unique-node row gather with the matmul kernel under one jit so
    # XLA schedules it around the custom call instead of as a separate pass.
    emb_bf16 = jnp.take(feat_padded_bf16, idx, axis=0)
    return mean_aggregate_pallas(mask_bf16, emb_bf16, inv_counts_f32, tm, tn, tk)


class MeanAggregatorPallas:
    """JAX/Pallas port of MeanAggregator. `feature_table` is a dense (N, D) lookup."""

    def __init__(self, feature_table, gcn=False):
        feature_table = jnp.asarray(feature_table, dtype=jnp.float32)
        self.num_nodes, self.feat_dim = feature_table.shape
        self.gcn = gcn
        # Pad the feature dim to a lane multiple ONCE; keep a bf16 copy to feed
        # the MXU (halves HBM traffic; accumulation stays f32 in the kernel).
        self._dp = _round_up(max(self.feat_dim, 128), 128)
        feat_np = np.zeros((self.num_nodes, self._dp), dtype=np.float32)
        feat_np[:, :self.feat_dim] = np.asarray(feature_table)
        self._feat_padded_bf16 = jnp.asarray(feat_np, dtype=jnp.bfloat16)

    def __call__(self, nodes, to_neighs, num_sample=10):
        # ---- host-side graph bookkeeping (no Pallas equivalent) ----
        # TODO(synk): python set sampling / dict construction stays on host.
        if num_sample is not None:
            samp_neighs = [
                set(random.sample(sorted(tn), num_sample))
                if len(tn) >= num_sample else set(tn)
                for tn in to_neighs
            ]
        else:
            samp_neighs = [set(tn) for tn in to_neighs]
        if self.gcn:
            samp_neighs = [sn | {nodes[i]} for i, sn in enumerate(samp_neighs)]

        unique_nodes_list = list(set.union(*samp_neighs))
        unique_nodes = {n: i for i, n in enumerate(unique_nodes_list)}

        B = len(samp_neighs)
        U = len(unique_nodes_list)
        D = self.feat_dim

        # Padded dims (16-aligned rows for bf16 sublane packing) + tile sizes.
        Bp = _round_up(max(B, 16), 16)
        Up = _round_up(max(U, 128), 128)
        Dp = self._dp
        tm = _pick_sublane_tile(Bp, 512)
        tn = _pick_lane_tile(Dp, 1024)
        tk = _pick_lane_tile(Up, 1024)
        tm, tn = _maybe_split_for_two_cores(Bp, Dp, tm, tn)

        # Build padded mask / inverse-degree / index arrays directly in numpy.
        mask_np = np.zeros((Bp, Up), dtype=np.float32)
        inv_np = np.ones((Bp, 1), dtype=np.float32)   # padded rows -> 1 (rows are 0)
        for i, sn in enumerate(samp_neighs):
            for n in sn:
                mask_np[i, unique_nodes[n]] = 1.0
            inv_np[i, 0] = 1.0 / max(len(sn), 1)      # host-side exact 1/deg
        idx_np = np.zeros((Up,), dtype=np.int32)
        idx_np[:U] = np.asarray(unique_nodes_list, dtype=np.int32)

        mask_bf16 = jnp.asarray(mask_np, dtype=jnp.bfloat16)        # exact 0/1
        inv_f32 = jnp.asarray(inv_np)
        idx = jnp.asarray(idx_np)

        out = _gather_and_aggregate(mask_bf16, self._feat_padded_bf16, idx,
                                    inv_f32, tm, tn, tk)
        return out[:B, :D]


if __name__ == "__main__":
    random.seed(0)

    num_nodes = 32
    feat_dim = 32
    batch = 8

    key = jax.random.PRNGKey(0)
    feature_table = jax.random.normal(key, (num_nodes, feat_dim),
                                      dtype=jnp.float32)

    nodes = list(range(batch))
    # Deterministic synthetic graph: node i has 8 neighbors (< num_sample=10,
    # so no random subsampling happens and the result is fully deterministic).
    to_neighs = [set((3 * i + k) % num_nodes for k in range(1, 9))
                 for i in nodes]

    agg = MeanAggregatorPallas(feature_table, gcn=False)
    to_feats = agg(nodes, to_neighs, num_sample=10)
    to_feats = jax.block_until_ready(to_feats)

    # Reference in plain numpy (mirror the kernel's bf16 cast of embeddings).
    samp_neighs = [set(tn) for tn in to_neighs]
    unique_nodes_list = list(set.union(*samp_neighs))
    unique_nodes = {n: i for i, n in enumerate(unique_nodes_list)}
    mask_ref = np.zeros((batch, len(unique_nodes_list)), dtype=np.float32)
    for i, sn in enumerate(samp_neighs):
        for n in sn:
            mask_ref[i, unique_nodes[n]] = 1.0
    mask_ref = mask_ref / mask_ref.sum(1, keepdims=True)
    emb_ref = np.asarray(
        feature_table.astype(jnp.bfloat16).astype(jnp.float32)
    )[np.asarray(unique_nodes_list)]
    ref = mask_ref @ emb_ref

    assert to_feats.shape == (batch, feat_dim)
    np.testing.assert_allclose(np.asarray(to_feats), ref, rtol=2e-4, atol=2e-4)
    print("KERNEL_OK")
</pallas_src>

<mosaic_0001>
module attributes {stable_mosaic.version = 11 : i64} {
  func.func @mean_agg_kernel(%arg0: i32, %arg1: i32, %arg2: i32, %arg3: memref<16x128xbf16, #tpu.memory_space<vmem>>, %arg4: memref<128x128xbf16, #tpu.memory_space<vmem>>, %arg5: memref<16x1xf32, #tpu.memory_space<vmem>>, %arg6: memref<16x128xf32, #tpu.memory_space<vmem>>, %arg7: memref<16x128xf32, #tpu.memory_space<vmem>>) attributes {dimension_semantics = [#tpu.dimension_semantics<parallel>, #tpu.dimension_semantics<parallel>, #tpu.dimension_semantics<arbitrary>], iteration_bounds = array<i64: 1, 1, 1>, scalar_prefetch = 0 : i64, scratch_operands = 1 : i64, tpu.core_type = #tpu.core_type<tc>, window_params = [{transform_indices = @transform_0, window_bounds = array<i64: 16, 128>}, {transform_indices = @transform_1, window_bounds = array<i64: 128, 128>}, {transform_indices = @transform_2, window_bounds = array<i64: 16, 1>}, {transform_indices = @transform_3, window_bounds = array<i64: 16, 128>}]} {
    %c0 = arith.constant 0 : index
    %c0_0 = arith.constant 0 : index
    %0 = vector.load %arg3[%c0, %c0_0] : memref<16x128xbf16, #tpu.memory_space<vmem>>, vector<16x128xbf16>
    %c0_1 = arith.constant 0 : index
    %c0_2 = arith.constant 0 : index
    %1 = vector.load %arg4[%c0_1, %c0_2] : memref<128x128xbf16, #tpu.memory_space<vmem>>, vector<128x128xbf16>
    %cst = arith.constant dense<0.000000e+00> : vector<16x128xf32>
    %2 = tpu.matmul %0, %1, %cst {dimension_numbers = #tpu.dot_dimension_numbers<[1], [0], [0], [1], [0, 0, 1, 1], [], []>} : vector<16x128xbf16>, vector<128x128xbf16>, vector<16x128xf32> -> vector<16x128xf32>
    %c0_i32 = arith.constant 0 : i32
    %3 = arith.cmpi eq, %arg2, %c0_i32 : i32
    %4 = arith.extui %3 : i1 to i32
    %c0_i32_3 = arith.constant 0 : i32
    %5 = arith.cmpi ne, %4, %c0_i32_3 : i32
    scf.if %5 {
      %c0_8 = arith.constant 0 : index
      %c0_9 = arith.constant 0 : index
      %12 = vector.load %arg7[%c0_8, %c0_9] : memref<16x128xf32, #tpu.memory_space<vmem>>, vector<16x128xf32>
      tpu.vector_store %arg7[%c0_8, %c0_9], %2 {strides = array<i32>} : memref<16x128xf32, #tpu.memory_space<vmem>>, vector<16x128xf32>,
    } else {
    }
    %c0_i32_4 = arith.constant 0 : i32
    %6 = arith.cmpi sgt, %arg2, %c0_i32_4 : i32
    %7 = arith.extui %6 : i1 to i32
    %c0_i32_5 = arith.constant 0 : i32
    %8 = arith.cmpi ne, %7, %c0_i32_5 : i32
    scf.if %8 {
      %c0_8 = arith.constant 0 : index
      %c0_9 = arith.constant 0 : index
      %12 = vector.load %arg7[%c0_8, %c0_9] : memref<16x128xf32, #tpu.memory_space<vmem>>, vector<16x128xf32>
      %13 = arith.addf %12, %2 : vector<16x128xf32>
      %c0_10 = arith.constant 0 : index
      %c0_11 = arith.constant 0 : index
      %14 = vector.load %arg7[%c0_10, %c0_11] : memref<16x128xf32, #tpu.memory_space<vmem>>, vector<16x128xf32>
      tpu.vector_store %arg7[%c0_10, %c0_11], %13 {strides = array<i32>} : memref<16x128xf32, #tpu.memory_space<vmem>>, vector<16x128xf32>,
    } else {
    }
    %c0_i32_6 = arith.constant 0 : i32
    %9 = arith.cmpi eq, %arg2, %c0_i32_6 : i32
    %10 = arith.extui %9 : i1 to i32
    %c0_i32_7 = arith.constant 0 : i32
    %11 = arith.cmpi ne, %10, %c0_i32_7 : i32
    scf.if %11 {
      %c0_8 = arith.constant 0 : index
      %c0_9 = arith.constant 0 : index
      %12 = vector.load %arg7[%c0_8, %c0_9] : memref<16x128xf32, #tpu.memory_space<vmem>>, vector<16x128xf32>
      %c0_10 = arith.constant 0 : index
      %c0_11 = arith.constant 0 : index
      %13 = vector.load %arg5[%c0_10, %c0_11] : memref<16x1xf32, #tpu.memory_space<vmem>>, vector<16x1xf32>
      %14 = vector.broadcast %13 : vector<16x1xf32> to vector<16x128xf32>
      %15 = arith.mulf %12, %14 : vector<16x128xf32>
      %c0_12 = arith.constant 0 : index
      %c0_13 = arith.constant 0 : index
      %16 = vector.load %arg6[%c0_12, %c0_13] : memref<16x128xf32, #tpu.memory_space<vmem>>, vector<16x128xf32>
      tpu.vector_store %arg6[%c0_12, %c0_13], %15 {strides = array<i32>} : memref<16x128xf32, #tpu.memory_space<vmem>>, vector<16x128xf32>,
    } else {
    }
    return
  }
  func.func @transform_0(%arg0: i32, %arg1: i32, %arg2: i32) -> (i32, i32) {
    %c0_i32 = arith.constant 0 : i32
    return %arg0, %arg2 : i32, i32
  }
  func.func @transform_1(%arg0: i32, %arg1: i32, %arg2: i32) -> (i32, i32) {
    %c0_i32 = arith.constant 0 : i32
    return %arg2, %arg1 : i32, i32
  }
  func.func @transform_2(%arg0: i32, %arg1: i32, %arg2: i32) -> (i32, i32) {
    %c0_i32 = arith.constant 0 : i32
    %c0_i32_0 = arith.constant 0 : i32
    return %arg0, %c0_i32 : i32, i32
  }
  func.func @transform_3(%arg0: i32, %arg1: i32, %arg2: i32) -> (i32, i32) {
    %c0_i32 = arith.constant 0 : i32
    return %arg0, %arg1 : i32, i32
  }
}

</mosaic_0001>

<bundles_post_ra>
// kernel: _gather_and_aggregate.1
= control target key start
LH: loop header
LB: loop body
LE: loop exit
PB: predicated region body
PF: predicated region fallthrough
CT: control target
= control target key end

     0   :  { %v232_v2 = vmov 0   ;;  %s292_s0 = inlined_call_operand.vmem [shape: bf16[16,128], index: 0, kind: input, shape index: {}]   ;;  %s293_s1 = inlined_call_operand.vmem [shape: bf16[128,128], index: 1, kind: input, shape index: {}]   ;;  %s294_s2 = inlined_call_operand.vmem [shape: f32[16,1], index: 2, kind: input, shape index: {}]   ;;  %s295_s3 = inlined_call_operand.hbm [shape: f32[16,128], index: 3, kind: output, shape index: {}]  }
   0x1   :  { %v200_v0 = vld [vmem:[%s293_s1 + $0x38] sm:$0xff]  ;;  %v199_v1 = vld [vmem:[%s293_s1 + $0x30] sm:$0xff]  ;;  %205 = vset.pattern.permute.xlu0 %v232_v2  ;;  %v122_v3 = vld [vmem:[%s294_s2] sm:$0xff] }
   0x2   :  { %87 = vmatpush.bf16.msra.mxu0 %v200_v0 }
   0x3   :  { %8 = vsyncpa [#allocation4], 0  ;;  %126 = vperm.xlu0 %205, %v122_v3   ;;  %v198_v4 = vld [vmem:[%s293_s1 + $0x28] sm:$0xff]  ;;  %v197_v6 = vld [vmem:[%s293_s1 + $0x20] sm:$0xff]  ;;  %s233_s6 = smov [#allocation3]   ;;  %s144_s10 = sshll.u32 %s295_s3, 4  ;;  %s145_s10 = int_to_ptr.hbm [resolvable:$true] %s144_s10 }
   0x4   :  { %v123_v5 = vld [vmem:[%s294_s2 + $0x8] sm:$0xff]  ;;  %v196_v7 = vld [vmem:[%s293_s1 + $0x18] sm:$0xff]  ;;  %v195_v8 = vld [vmem:[%s293_s1 + $0x10] sm:$0xff]  ;;  %s142_s7 = sshll.u32 %s233_s6, 4  ;;  %s143_s7 = int_to_ptr.vmem [resolvable:$true] %s142_s7 }
   0x5   :  { %v194_v9 = vld [vmem:[%s293_s1 + $0x8] sm:$0xff]  ;;  %v193_v10 = vld [vmem:[%s293_s1] sm:$0xff]  ;;  %s234_s1 = smov 128  }
   0x6   :  { %88 = vmatpush.bf16.msra.mxu0 %v199_v1  ;;  %v192_v11 = vld [vmem:[%s292_s0] sm:$0xff]  ;;  %s235_s0 = smov 8  }
   0xa   :  { %89 = vmatpush.bf16.msra.mxu0 %v198_v4 }
   0xb   :  { %131 = vperm.xlu0 %205, %v123_v5  }
   0xe   :  { %90 = vmatpush.bf16.msra.mxu0 %v197_v6 }
  0x12   :  { %91 = vmatpush.bf16.msra.mxu0 %v196_v7 }
  0x16   :  { %92 = vmatpush.bf16.msra.mxu0 %v195_v8 }
  0x1a   :  { %93 = vmatpush.bf16.msra.mxu0 %v194_v9 }
  0x1e   :  { %94 = vmatpush.bf16.msra.mxu0 %v193_v10 }
  0x21   :  { %95 = vmatmul.bf16.vlgmr.msra.gmra.mxu0 %v192_v11 }
  0x75   :  { %v127_v12 = vpop.permute.xlu0 %126 }
  0x7d   :  { %v132_v15 = vpop.permute.xlu0 %131 }
  0x9e   :  { %v96_v13 = vpop.f32.mrf.mxu0 }
  0x9f   :  { %v134_v14 = vmul.f32 %v127_v12, %v96_v13 }
  0xa1   :  { %136 = vst [vmem:[#allocation3] sm:$0xff] %v134_v14 }
  0xa6   :  { %v98_v16 = vpop.f32.mrf.mxu0 }
  0xa7   :  { %v135_v17 = vmul.f32 %v132_v15, %v98_v16 }
  0xa9   :  { %137 = vst [vmem:[#allocation3 + $0x8] sm:$0xff] %v135_v17 }
  0xaa   :  { %150 = dma.vmem_to_hbm [thread:$0]  %s143_s7, 256, %s145_s10, [#allocation4], %s234_s1, %s234_s1, %s235_s0  }
  0xab   :  { %230 = dma.done.wait [#allocation4], 256  }
  0xac   :  { %231 = vsyncadd [#allocation4], 4294967040 }
  0xad   :  { %155 = vsyncpa [#allocation4], 1 }

</bundles_post_ra>
